<compile_context>
chip_gen: v5e
topology: v5e:2x2
jax: 0.10.0
libtpu: 0.0.40
codegen_flags: <defaults>
</compile_context>

<pallas_src>
import functools

import jax
import jax.numpy as jnp
from jax import lax
from jax.experimental import pallas as pl
from jax.experimental.pallas import tpu as pltpu

_IGNORE_INDEX = -100          # PyTorch F.cross_entropy default
_FAST_PATH_ELEMS = 4096       # below this, a fused XLA op beats kernel launch
_ROW_ALIGN = 32               # floor alignment for auto-chosen row tiles
_MAX_TILE_ROWS = 2048
_MIN_TILE_ROWS = 256          # target row-tile height before chunking classes
_MIN_ROW_TILES = 4            # keep >=4 row tiles so both v7x TCs stay busy


# ----------------------------------------------------------------------------
# Per-generation VMEM budgets + tile selection
# ----------------------------------------------------------------------------
@functools.lru_cache(maxsize=1)
def _vmem_budgets():
    """(vmem_limit_bytes, data_tile_budget_bytes) for the local TPU generation."""
    phys = None
    try:
        phys = getattr(pltpu.get_tpu_info(), "vmem_capacity_bytes", None)
    except Exception:
        phys = None
    if not phys or phys <= 64 * 1024 * 1024:
        # v7x-class (64 MiB physical per TC) or unknown: stay conservative.
        return 48 * 1024 * 1024, 16 * 1024 * 1024
    # v5e / v6e: 128 MiB physical VMEM -> bigger tiles, closer to HBM roofline.
    return 96 * 1024 * 1024, 40 * 1024 * 1024


def _row_align(*dtypes):
    """Sublane multiple needed by the narrowest participating dtype."""
    min_bytes = min(jnp.dtype(d).itemsize for d in dtypes)
    return {4: 8, 2: 16, 1: 32}.get(min_bytes, 8)


def _choose_tiles(n, c, per_elem_bytes, per_row_bytes, budget, row_align,
                  tile_rows=None, tile_cols=None):
    """Pick (tile_n, tile_c): lane dim multiple of 128 (or full C), sublane dim
    multiple of `row_align` (or full N), sized to the VMEM data budget."""
    # ---- class-chunk width ----
    if tile_cols is not None:
        tc = max(128, (int(tile_cols) // 128) * 128)
    elif _MIN_TILE_ROWS * (c * per_elem_bytes + per_row_bytes) <= budget:
        tc = c                               # full C fits at >= _MIN_TILE_ROWS rows
    else:
        tc = (budget // _MIN_TILE_ROWS - per_row_bytes) // per_elem_bytes
        tc = max(128, (int(tc) // 128) * 128)
    if tc >= c:
        tc = c

    # ---- row-tile height ----
    if tile_rows is not None:
        tn = max(row_align, (int(tile_rows) // row_align) * row_align)
    else:
        align = max(row_align, _ROW_ALIGN)
        tn = int(budget // (tc * per_elem_bytes + per_row_bytes))
        tn = max(align, min(tn, _MAX_TILE_ROWS))
        tn = (tn // align) * align
        # megacore: prefer >= _MIN_ROW_TILES row tiles when N is big enough
        if n >= _MIN_ROW_TILES * align:
            cap = pl.cdiv(n, _MIN_ROW_TILES)
            cap = ((cap + align - 1) // align) * align
            tn = min(tn, cap)
    if tn >= n:
        tn = n
    return tn, tc


# ----------------------------------------------------------------------------
# Kernel 1: softmax cross-entropy, online logsumexp over class chunks
# ----------------------------------------------------------------------------
def _ce_kernel(n_rows, n_cols, ignore_index, mask_rows, mask_cols,
               preds_ref, tgt_ref, out_ref, m_sc, se_sc, tl_sc):
    i = pl.program_id(0)                    # row tile     (parallel)
    j = pl.program_id(1)                    # class chunk  (arbitrary / reduction)
    nj = pl.num_programs(1)

    x = preds_ref[...]                      # (TN, TC), native dtype (no eager upcast)
    tn, tc = x.shape
    tgt = tgt_ref[...]                      # (TN, 1) int32

    @pl.when(j == 0)
    def _init():
        m_sc[...] = jnp.full((tn, 1), -jnp.inf, jnp.float32)
        se_sc[...] = jnp.zeros((tn, 1), jnp.float32)
        tl_sc[...] = jnp.zeros((tn, 1), jnp.float32)

    # global class index of every lane in this chunk
    cls = lax.broadcasted_iota(jnp.int32, (tn, tc), 1) + j * tc

    # drop padded class lanes (only when C % TILE_C != 0) out of max & exp-sum
    xm = jnp.where(cls < n_cols, x, -jnp.inf) if mask_cols else x

    # online logsumexp update; max stays in the input dtype (bf16-friendly),
    # exp / accumulation are f32
    m_prev = m_sc[...]
    m_new = jnp.maximum(m_prev,
                        jnp.max(xm, axis=-1, keepdims=True).astype(jnp.float32))
    se_sc[...] = se_sc[...] * jnp.exp(m_prev - m_new) + jnp.sum(
        jnp.exp(xm.astype(jnp.float32) - m_new), axis=-1, keepdims=True)
    m_sc[...] = m_new

    # accumulate the raw target logit via one-hot select; a match can only
    # happen in one chunk and never on padded lanes (valid tgt < n_cols)
    tl_sc[...] += jnp.sum(jnp.where(cls == tgt, x, 0).astype(jnp.float32),
                          axis=-1, keepdims=True)

    @pl.when(j == nj - 1)
    def _finalize():
        valid = tgt != ignore_index
        if mask_rows:
            row = lax.broadcasted_iota(jnp.int32, (tn, 1), 0) + i * tn
            valid = valid & (row < n_rows)
        nll = jnp.where(valid, jnp.log(se_sc[...]) + m_sc[...] - tl_sc[...], 0.0)
        out_ref[...] = jnp.full((1, 8, 128), jnp.sum(nll), jnp.float32)


# ----------------------------------------------------------------------------
# Kernel 2: binary cross-entropy with logits (multi_label path)
# ----------------------------------------------------------------------------
def _bce_kernel(n_rows, n_cols, mask_rows, mask_cols,
                preds_ref, tgt_ref, out_ref):
    i = pl.program_id(0)
    j = pl.program_id(1)
    x = preds_ref[...].astype(jnp.float32)
    t = tgt_ref[...].astype(jnp.float32)     # narrow (int8/bool/bf16) targets cast here
    tn, tc = x.shape

    # stable: max(x,0) - x*t + log1p(exp(-|x|))
    # TODO(synk): on v7x / bf16-v6e the 2 EUP ops/elem (exp + log1p) may bind
    # before HBM; a short VALU polynomial for log1p on (0,1] would halve it.
    per = jnp.maximum(x, 0.0) - x * t + jnp.log1p(jnp.exp(-jnp.abs(x)))

    if mask_rows or mask_cols:
        ok = None
        if mask_rows:
            row = lax.broadcasted_iota(jnp.int32, (tn, tc), 0) + i * tn
            ok = row < n_rows
        if mask_cols:
            col = lax.broadcasted_iota(jnp.int32, (tn, tc), 1) + j * tc
            ok = (col < n_cols) if ok is None else (ok & (col < n_cols))
        per = jnp.where(ok, per, 0.0)
    out_ref[...] = jnp.full((1, 8, 128), jnp.sum(per), jnp.float32)


# ----------------------------------------------------------------------------
# Wrappers
# ----------------------------------------------------------------------------
def cross_entropy_loss(preds: jax.Array, targets: jax.Array, *,
                       tile_rows: int | None = None,
                       tile_cols: int | None = None) -> jax.Array:
    """F.cross_entropy(preds, targets): preds (N, C) float, targets (N,) int.
    Mean over rows with target != -100 (0/0 = NaN if all rows ignored)."""
    n, c = preds.shape
    targets = targets.astype(jnp.int32)
    vmask = targets != _IGNORE_INDEX
    valid_count = jnp.sum(vmask.astype(jnp.float32))

    if n * c <= _FAST_PATH_ELEMS:
        logp = jax.nn.log_softmax(preds.astype(jnp.float32), axis=-1)
        safe_t = jnp.where(vmask, targets, 0)
        nll = -jnp.take_along_axis(logp, safe_t[:, None], axis=-1)[:, 0]
        return jnp.sum(jnp.where(vmask, nll, 0.0)) / valid_count

    vmem_limit, budget = _vmem_budgets()
    ib = jnp.dtype(preds.dtype).itemsize
    per_elem = 2 * ib + 24        # 2x double-buffered preds + f32/int32 in-kernel temps
    per_row = 3072                # padded (TN,1) int32 targets (x2) + 3 f32 scratch rows
    tile_n, tile_c = _choose_tiles(n, c, per_elem, per_row, budget,
                                   _row_align(preds.dtype, jnp.int32),
                                   tile_rows, tile_cols)
    n_row_tiles = pl.cdiv(n, tile_n)
    n_col_chunks = pl.cdiv(c, tile_c)
    mask_rows = (n % tile_n) != 0
    mask_cols = (c % tile_c) != 0

    kernel = functools.partial(_ce_kernel, n, c, _IGNORE_INDEX,
                               mask_rows, mask_cols)
    partials = pl.pallas_call(
        kernel,
        out_shape=jax.ShapeDtypeStruct((n_row_tiles, 8, 128), jnp.float32),
        grid=(n_row_tiles, n_col_chunks),
        in_specs=[
            pl.BlockSpec((tile_n, tile_c), lambda i, j: (i, j)),
            pl.BlockSpec((tile_n, 1), lambda i, j: (i, 0)),
        ],
        out_specs=pl.BlockSpec((1, 8, 128), lambda i, j: (i, 0, 0)),
        scratch_shapes=[pltpu.VMEM((tile_n, 1), jnp.float32) for _ in range(3)],
        compiler_params=pltpu.CompilerParams(
            dimension_semantics=("parallel", "arbitrary"),
            vmem_limit_bytes=vmem_limit),
    )(preds, targets.reshape(n, 1))
    return jnp.sum(partials[:, 0, 0]) / valid_count


def bce_with_logits_loss(preds: jax.Array, targets: jax.Array, *,
                         tile_rows: int | None = None,
                         tile_cols: int | None = None) -> jax.Array:
    """F.binary_cross_entropy_with_logits(preds, targets.float()), mean."""
    n, c = preds.shape
    tgt = targets
    if tgt.dtype == jnp.bool_:
        tgt = tgt.astype(jnp.int8)    # keep targets narrow in HBM
    tgt = tgt.reshape(n, c)

    if n * c <= _FAST_PATH_ELEMS:
        x = preds.astype(jnp.float32)
        tf = tgt.astype(jnp.float32)
        return jnp.mean(jnp.maximum(x, 0.0) - x * tf + jnp.log1p(jnp.exp(-jnp.abs(x))))

    vmem_limit, budget = _vmem_budgets()
    pb = jnp.dtype(preds.dtype).itemsize
    tb = jnp.dtype(tgt.dtype).itemsize
    per_elem = 2 * pb + 2 * tb + 20
    per_row = 1024
    tile_n, tile_c = _choose_tiles(n, c, per_elem, per_row, budget,
                                   _row_align(preds.dtype, tgt.dtype),
                                   tile_rows, tile_cols)
    n_row_tiles = pl.cdiv(n, tile_n)
    n_col_chunks = pl.cdiv(c, tile_c)
    mask_rows = (n % tile_n) != 0
    mask_cols = (c % tile_c) != 0

    kernel = functools.partial(_bce_kernel, n, c, mask_rows, mask_cols)
    partials = pl.pallas_call(
        kernel,
        out_shape=jax.ShapeDtypeStruct((n_row_tiles * n_col_chunks, 8, 128),
                                       jnp.float32),
        grid=(n_row_tiles, n_col_chunks),
        in_specs=[
            pl.BlockSpec((tile_n, tile_c), lambda i, j: (i, j)),
            pl.BlockSpec((tile_n, tile_c), lambda i, j: (i, j)),
        ],
        out_specs=pl.BlockSpec((1, 8, 128),
                               lambda i, j: (i * n_col_chunks + j, 0, 0)),
        compiler_params=pltpu.CompilerParams(
            dimension_semantics=("parallel", "parallel"),
            vmem_limit_bytes=vmem_limit),
    )(preds, tgt)
    return jnp.sum(partials[:, 0, 0]) / jnp.float32(n * c)


class CESourceOnly:
    """JAX/Pallas port of dalib.CE.CESourceOnly (forward only, no parameters)."""

    def __init__(self, num_classes=None, multi_label=False, **kwargs):
        self.multi_label = multi_label

    def __call__(self, preds: jax.Array, targets: jax.Array) -> jax.Array:
        if self.multi_label:
            return bce_with_logits_loss(preds, targets)
        return cross_entropy_loss(preds, targets)


# ----------------------------------------------------------------------------
# Demo / self-check
# ----------------------------------------------------------------------------
if __name__ == "__main__":
    key = jax.random.PRNGKey(0)
    ks = jax.random.split(key, 8)

    # --- 1) CE, Pallas path (single tile), incl. one ignore_index row ---
    N, C = 64, 128
    preds = jax.random.normal(ks[0], (N, C), dtype=jnp.float32)
    targets = jax.random.randint(ks[1], (N,), 0, C, dtype=jnp.int32)
    targets = targets.at[3].set(_IGNORE_INDEX)
    ce = CESourceOnly(num_classes=C, multi_label=False)
    loss = jax.block_until_ready(ce(preds, targets))
    logp = jax.nn.log_softmax(preds, axis=-1)
    vm = targets != _IGNORE_INDEX
    nll_ref = -jnp.take_along_axis(logp, jnp.where(vm, targets, 0)[:, None],
                                   axis=-1)[:, 0]
    ref = jnp.sum(jnp.where(vm, nll_ref, 0.0)) / jnp.sum(vm.astype(jnp.float32))
    assert jnp.allclose(loss, ref, atol=1e-5, rtol=1e-5), (loss, ref)

    # --- 2) CE, class-chunked online-logsumexp path, partial row & class tiles ---
    N2, C2 = 40, 200
    preds2 = jax.random.normal(ks[2], (N2, C2), dtype=jnp.float32)
    targets2 = jax.random.randint(ks[3], (N2,), 0, C2, dtype=jnp.int32)
    loss2 = jax.block_until_ready(
        cross_entropy_loss(preds2, targets2, tile_rows=16, tile_cols=128))
    logp2 = jax.nn.log_softmax(preds2, axis=-1)
    ref2 = -jnp.mean(jnp.take_along_axis(logp2, targets2[:, None], axis=-1))
    assert jnp.allclose(loss2, ref2, atol=1e-5, rtol=1e-5), (loss2, ref2)

    # --- 3) multi-label (BCE with logits), narrow int8 targets, Pallas path ---
    ml_targets = (jax.random.uniform(ks[4], (N, C)) > 0.5).astype(jnp.int8)
    ml = CESourceOnly(num_classes=C, multi_label=True)
    ml_loss = jax.block_until_ready(ml(preds, ml_targets))
    tf = ml_targets.astype(jnp.float32)
    ml_ref = jnp.mean(jnp.maximum(preds, 0.0) - preds * tf
                      + jnp.log1p(jnp.exp(-jnp.abs(preds))))
    assert jnp.allclose(ml_loss, ml_ref, atol=1e-5, rtol=1e-5), (ml_loss, ml_ref)

    # --- 4) BCE, chunked 2-D parallel grid with partial row & class tiles ---
    bt = (jax.random.uniform(ks[5], (N2, C2)) > 0.5).astype(jnp.float32)
    bl = jax.block_until_ready(
        bce_with_logits_loss(preds2, bt, tile_rows=16, tile_cols=128))
    bref = jnp.mean(jnp.maximum(preds2, 0.0) - preds2 * bt
                    + jnp.log1p(jnp.exp(-jnp.abs(preds2))))
    assert jnp.allclose(bl, bref, atol=1e-5, rtol=1e-5), (bl, bref)

    # --- 5) tiny-shape fast path (8x32): fused XLA, no kernel launch ---
    sp = jax.random.normal(ks[6], (8, 32), dtype=jnp.float32)
    st = jax.random.randint(ks[7], (8,), 0, 32, dtype=jnp.int32)
    small = jax.block_until_ready(ce(sp, st))
    sref = -jnp.mean(jnp.take_along_axis(jax.nn.log_softmax(sp, -1),
                                         st[:, None], axis=-1))
    assert jnp.allclose(small, sref, atol=1e-5, rtol=1e-5), (small, sref)

    print("KERNEL_OK")
</pallas_src>

<mosaic_0001>
module attributes {stable_mosaic.version = 11 : i64} {
  func.func @_ce_kernel(%arg0: i32, %arg1: i32, %arg2: memref<64x128xf32, #tpu.memory_space<vmem>>, %arg3: memref<64x1xi32, #tpu.memory_space<vmem>>, %arg4: memref<1x8x128xf32, #tpu.memory_space<vmem>>, %arg5: memref<64x1xf32, #tpu.memory_space<vmem>>, %arg6: memref<64x1xf32, #tpu.memory_space<vmem>>, %arg7: memref<64x1xf32, #tpu.memory_space<vmem>>) attributes {dimension_semantics = [#tpu.dimension_semantics<parallel>, #tpu.dimension_semantics<arbitrary>], iteration_bounds = array<i64: 1, 1>, scalar_prefetch = 0 : i64, scratch_operands = 3 : i64, tpu.core_type = #tpu.core_type<tc>, window_params = [{transform_indices = @transform_0, window_bounds = array<i64: 64, 128>}, {transform_indices = @transform_1, window_bounds = array<i64: 64, 1>}, {transform_indices = @transform_2, window_bounds = array<i64: 1, 8, 128>}]} {
    %c0 = arith.constant 0 : index
    %c0_0 = arith.constant 0 : index
    %0 = vector.load %arg2[%c0, %c0_0] : memref<64x128xf32, #tpu.memory_space<vmem>>, vector<64x128xf32>
    %c0_1 = arith.constant 0 : index
    %c0_2 = arith.constant 0 : index
    %1 = vector.load %arg3[%c0_1, %c0_2] : memref<64x1xi32, #tpu.memory_space<vmem>>, vector<64x1xi32>
    %c0_i32 = arith.constant 0 : i32
    %2 = arith.cmpi eq, %arg1, %c0_i32 : i32
    %3 = arith.extui %2 : i1 to i32
    %c0_i32_3 = arith.constant 0 : i32
    %4 = arith.cmpi ne, %3, %c0_i32_3 : i32
    scf.if %4 {
      %cst_21 = arith.constant 0xFF800000 : f32
      %38 = vector.broadcast %cst_21 : f32 to vector<64x1xf32>
      %c0_22 = arith.constant 0 : index
      %c0_23 = arith.constant 0 : index
      %39 = vector.load %arg5[%c0_22, %c0_23] : memref<64x1xf32, #tpu.memory_space<vmem>>, vector<64x1xf32>
      tpu.vector_store %arg5[%c0_22, %c0_23], %38 {strides = array<i32>} : memref<64x1xf32, #tpu.memory_space<vmem>>, vector<64x1xf32>,
      %cst_24 = arith.constant 0.000000e+00 : f32
      %40 = vector.broadcast %cst_24 : f32 to vector<64x1xf32>
      %c0_25 = arith.constant 0 : index
      %c0_26 = arith.constant 0 : index
      %41 = vector.load %arg6[%c0_25, %c0_26] : memref<64x1xf32, #tpu.memory_space<vmem>>, vector<64x1xf32>
      tpu.vector_store %arg6[%c0_25, %c0_26], %40 {strides = array<i32>} : memref<64x1xf32, #tpu.memory_space<vmem>>, vector<64x1xf32>,
      %cst_27 = arith.constant 0.000000e+00 : f32
      %42 = vector.broadcast %cst_27 : f32 to vector<64x1xf32>
      %c0_28 = arith.constant 0 : index
      %c0_29 = arith.constant 0 : index
      %43 = vector.load %arg7[%c0_28, %c0_29] : memref<64x1xf32, #tpu.memory_space<vmem>>, vector<64x1xf32>
      tpu.vector_store %arg7[%c0_28, %c0_29], %42 {strides = array<i32>} : memref<64x1xf32, #tpu.memory_space<vmem>>, vector<64x1xf32>,
    } else {
    }
    %5 = tpu.iota {dimensions = array<i32: 1>} : vector<64x128xi32>
    %c128_i32 = arith.constant 128 : i32
    %6 = arith.muli %arg1, %c128_i32 : i32
    %7 = vector.broadcast %6 : i32 to vector<64x128xi32>
    %8 = arith.addi %5, %7 : vector<64x128xi32>
    %c0_4 = arith.constant 0 : index
    %c0_5 = arith.constant 0 : index
    %9 = vector.load %arg5[%c0_4, %c0_5] : memref<64x1xf32, #tpu.memory_space<vmem>>, vector<64x1xf32>
    %cst = arith.constant dense<0xFF800000> : vector<64xf32>
    %10 = vector.multi_reduction <maximumf>, %0, %cst [1] : vector<64x128xf32> to vector<64xf32>
    %11 = vector.shape_cast %10 : vector<64xf32> to vector<64x1xf32>
    %12 = arith.maximumf %9, %11 : vector<64x1xf32>
    %c0_6 = arith.constant 0 : index
    %c0_7 = arith.constant 0 : index
    %13 = vector.load %arg6[%c0_6, %c0_7] : memref<64x1xf32, #tpu.memory_space<vmem>>, vector<64x1xf32>
    %14 = arith.subf %9, %12 : vector<64x1xf32>
    %15 = math.exp %14 : vector<64x1xf32>
    %16 = arith.mulf %13, %15 : vector<64x1xf32>
    %17 = vector.broadcast %12 : vector<64x1xf32> to vector<64x128xf32>
    %18 = arith.subf %0, %17 : vector<64x128xf32>
    %19 = math.exp %18 : vector<64x128xf32>
    %cst_8 = arith.constant dense<0.000000e+00> : vector<64xf32>
    %20 = vector.multi_reduction <add>, %19, %cst_8 [1] : vector<64x128xf32> to vector<64xf32>
    %21 = vector.shape_cast %20 : vector<64xf32> to vector<64x1xf32>
    %22 = arith.addf %16, %21 : vector<64x1xf32>
    %c0_9 = arith.constant 0 : index
    %c0_10 = arith.constant 0 : index
    %23 = vector.load %arg6[%c0_9, %c0_10] : memref<64x1xf32, #tpu.memory_space<vmem>>, vector<64x1xf32>
    tpu.vector_store %arg6[%c0_9, %c0_10], %22 {strides = array<i32>} : memref<64x1xf32, #tpu.memory_space<vmem>>, vector<64x1xf32>,
    %c0_11 = arith.constant 0 : index
    %c0_12 = arith.constant 0 : index
    %24 = vector.load %arg5[%c0_11, %c0_12] : memref<64x1xf32, #tpu.memory_space<vmem>>, vector<64x1xf32>
    tpu.vector_store %arg5[%c0_11, %c0_12], %12 {strides = array<i32>} : memref<64x1xf32, #tpu.memory_space<vmem>>, vector<64x1xf32>,
    %c0_13 = arith.constant 0 : index
    %c0_14 = arith.constant 0 : index
    %25 = vector.load %arg7[%c0_13, %c0_14] : memref<64x1xf32, #tpu.memory_space<vmem>>, vector<64x1xf32>
    %26 = vector.broadcast %1 : vector<64x1xi32> to vector<64x128xi32>
    %27 = arith.cmpi eq, %8, %26 : vector<64x128xi32>
    %c0_i32_15 = arith.constant 0 : i32
    %28 = arith.sitofp %c0_i32_15 : i32 to f32
    %29 = vector.broadcast %28 : f32 to vector<64x128xf32>
    %30 = arith.select %27, %0, %29 : vector<64x128xi1>, vector<64x128xf32>
    %cst_16 = arith.constant dense<0.000000e+00> : vector<64xf32>
    %31 = vector.multi_reduction <add>, %30, %cst_16 [1] : vector<64x128xf32> to vector<64xf32>
    %32 = vector.shape_cast %31 : vector<64xf32> to vector<64x1xf32>
    %33 = arith.addf %25, %32 : vector<64x1xf32>
    %c0_17 = arith.constant 0 : index
    %c0_18 = arith.constant 0 : index
    %34 = vector.load %arg7[%c0_17, %c0_18] : memref<64x1xf32, #tpu.memory_space<vmem>>, vector<64x1xf32>
    tpu.vector_store %arg7[%c0_17, %c0_18], %33 {strides = array<i32>} : memref<64x1xf32, #tpu.memory_space<vmem>>, vector<64x1xf32>,
    %c0_i32_19 = arith.constant 0 : i32
    %35 = arith.cmpi eq, %arg1, %c0_i32_19 : i32
    %36 = arith.extui %35 : i1 to i32
    %c0_i32_20 = arith.constant 0 : i32
    %37 = arith.cmpi ne, %36, %c0_i32_20 : i32
    scf.if %37 {
      %c-100_i32 = arith.constant -100 : i32
      %38 = vector.broadcast %c-100_i32 : i32 to vector<64x1xi32>
      %39 = arith.cmpi ne, %1, %38 : vector<64x1xi32>
      %c0_21 = arith.constant 0 : index
      %c0_22 = arith.constant 0 : index
      %40 = vector.load %arg6[%c0_21, %c0_22] : memref<64x1xf32, #tpu.memory_space<vmem>>, vector<64x1xf32>
      %41 = math.log %40 : vector<64x1xf32>
      %c0_23 = arith.constant 0 : index
      %c0_24 = arith.constant 0 : index
      %42 = vector.load %arg5[%c0_23, %c0_24] : memref<64x1xf32, #tpu.memory_space<vmem>>, vector<64x1xf32>
      %43 = arith.addf %41, %42 : vector<64x1xf32>
      %c0_25 = arith.constant 0 : index
      %c0_26 = arith.constant 0 : index
      %44 = vector.load %arg7[%c0_25, %c0_26] : memref<64x1xf32, #tpu.memory_space<vmem>>, vector<64x1xf32>
      %45 = arith.subf %43, %44 : vector<64x1xf32>
      %cst_27 = arith.constant 0.000000e+00 : f32
      %46 = vector.broadcast %cst_27 : f32 to vector<64x1xf32>
      %47 = arith.select %39, %45, %46 : vector<64x1xi1>, vector<64x1xf32>
      %48 = vector.shape_cast %47 : vector<64x1xf32> to vector<1x64x1xf32>
      %cst_28 = arith.constant dense<0.000000e+00> : vector<1xf32>
      %49 = vector.multi_reduction <add>, %48, %cst_28 [1, 2] : vector<1x64x1xf32> to vector<1xf32>
      %50 = vector.shape_cast %49 : vector<1xf32> to vector<1x1x1xf32>
      %51 = vector.extract %50[0, 0, 0] : f32 from vector<1x1x1xf32>
      %52 = vector.broadcast %51 : f32 to vector<1x8x128xf32>
      %c0_29 = arith.constant 0 : index
      %c0_30 = arith.constant 0 : index
      %c0_31 = arith.constant 0 : index
      %53 = vector.load %arg4[%c0_29, %c0_30, %c0_31] : memref<1x8x128xf32, #tpu.memory_space<vmem>>, vector<1x8x128xf32>
      tpu.vector_store %arg4[%c0_29, %c0_30, %c0_31], %52 {strides = array<i32>} : memref<1x8x128xf32, #tpu.memory_space<vmem>>, vector<1x8x128xf32>,
    } else {
    }
    return
  }
  func.func @transform_0(%arg0: i32, %arg1: i32) -> (i32, i32) {
    %c0_i32 = arith.constant 0 : i32
    return %arg0, %arg1 : i32, i32
  }
  func.func @transform_1(%arg0: i32, %arg1: i32) -> (i32, i32) {
    %c0_i32 = arith.constant 0 : i32
    %c0_i32_0 = arith.constant 0 : i32
    return %arg0, %c0_i32 : i32, i32
  }
  func.func @transform_2(%arg0: i32, %arg1: i32) -> (i32, i32, i32) {
    %c0_i32 = arith.constant 0 : i32
    %c0_i32_0 = arith.constant 0 : i32
    %c0_i32_1 = arith.constant 0 : i32
    return %arg0, %c0_i32, %c0_i32_0 : i32, i32, i32
  }
}

</mosaic_0001>

<bundles_post_ra>
// kernel: tpu_custom_call.1
= control target key start
LH: loop header
LB: loop body
LE: loop exit
PB: predicated region body
PF: predicated region fallthrough
CT: control target
= control target key end

     0   :  { %v519_v3 = vmov 0   ;;  %s827_s0 = inlined_call_operand.vmem [shape: f32[64,128], index: 0, kind: input, shape index: {}]   ;;  %s828_s1 = inlined_call_operand.vmem [shape: s32[64,1], index: 1, kind: input, shape index: {}]   ;;  %s829_s2 = inlined_call_operand.hbm [shape: f32[1,8,128], index: 2, kind: output, shape index: {}]  }
   0x1   :  { %v541_v0 = vld [vmem:[%s827_s0 + $0x20] sm:$0xff]  ;;  %v546_v1 = vld [vmem:[%s827_s0 + $0x10] sm:$0xff]  ;;  %444 = vset.pattern.permute.xlu1 %v519_v3  ;;  %442 = vset.pattern.permute.xlu0 %v519_v3 }
   0x2   :  { %v551_v2 = vld [vmem:[%s827_s0] sm:$0xff]  ;;  %78 = vmax.xlane.f32.xlu2 %v541_v0  ;;  %74 = vmax.xlane.f32.xlu1 %v546_v1 }
   0x3   :  { %70 = vmax.xlane.f32.xlu0 %v551_v2  ;;  %443 = vset.pattern.permute.xlu2 %v519_v3 }
   0x4   :  { %7 = vsyncpa [#allocation6], 0  ;;  %v559_v4 = vld [vmem:[%s827_s0 + $0x28] sm:$0xff]  ;;  %v564_v5 = vld [vmem:[%s827_s0 + $0x18] sm:$0xff]  ;;  %vm32_vm0 = vcmask 7168   ;;  %v520_v9 = vmov -inf   ;;  %v57_v51 = vlaneseq }
   0x5   :  { %v569_v6 = vld [vmem:[%s827_s0 + $0x8] sm:$0xff]  ;;  %v577_v7 = vld [vmem:[%s827_s0 + $0x38] sm:$0xff]  ;;  %v582_v8 = vld [vmem:[%s827_s0 + $0x30] sm:$0xff]  ;;  %37 = vst.msk [vmem:[#allocation2 + $0x20] sm:$0xff] %vm32_vm0, %v520_v9  ;;  %v521_v17 = vmov 0.0   ;;  %s427_s15 = sshll.u32 %s829_s2, 4  ;;  %s428_s15 = int_to_ptr.hbm [resolvable:$true] %s427_s15 }
   0x6   :  { %33 = vst.msk [vmem:[#allocation2] sm:$0xff] %vm32_vm0, %v520_v9  ;;  %v596_v10 = vld [vmem:[%s828_s1 + $0x8] sm:$0xff]  ;;  %v603_v11 = vld [vmem:[%s828_s1] sm:$0xff]  ;;  %v614_v13 = vld [vmem:[%s828_s1 + $0x10] sm:$0xff]  ;;  %v738_v52 = vand.u32 127, %v57_v51 }
   0x7   :  { %34 = vst.msk [vmem:[#allocation2 + $0x8] sm:$0xff] %vm32_vm0, %v520_v9  ;;  %v609_v12 = vld [vmem:[%s828_s1 + $0x20] sm:$0xff]  ;;  %v621_v14 = vld [vmem:[%s828_s1 + $0x18] sm:$0xff]  ;;  %v627_v15 = vld [vmem:[%s828_s1 + $0x28] sm:$0xff]  ;;  %vm322_vm9 = vcmp.ne.s32.totalorder %v603_v11, 4294967196  ;;  %vm324_vm10 = vcmp.ne.s32.totalorder %v614_v13, 4294967196 }
   0x8   :  { %35 = vst.msk [vmem:[#allocation2 + $0x10] sm:$0xff] %vm32_vm0, %v520_v9  ;;  %v633_v16 = vld [vmem:[%s828_s1 + $0x30] sm:$0xff]  ;;  %v735_v50 = vld [vmem:[%s828_s1 + $0x38] sm:$0xff]  ;;  %vm323_vm11 = vcmp.ne.s32.totalorder %v596_v10, 4294967196  ;;  %vm325_vm12 = vcmp.ne.s32.totalorder %v621_v14, 4294967196  ;;  %vm326_vm13 = vcmp.ne.s32.totalorder %v609_v12, 4294967196 }
   0x9   :  { %36 = vst.msk [vmem:[#allocation2 + $0x18] sm:$0xff] %vm32_vm0, %v520_v9  ;;  %vm327_vm14 = vcmp.ne.s32.totalorder %v627_v15, 4294967196  ;;  %vm328_vm15 = vcmp.ne.s32.totalorder %v633_v16, 4294967196  ;;  %s522_s1 = smov [#allocation5]  }
   0xa   :  { %80 = vmax.xlane.f32.xlu2 %v559_v4  ;;  %76 = vmax.xlane.f32.xlu1 %v564_v5  ;;  %38 = vst.msk [vmem:[#allocation2 + $0x28] sm:$0xff] %vm32_vm0, %v520_v9  ;;  %s425_s12 = sshll.u32 %s522_s1, 4  ;;  %s426_s12 = int_to_ptr.vmem [resolvable:$true] %s425_s12 }
   0xb   :  { %72 = vmax.xlane.f32.xlu0 %v569_v6  ;;  %39 = vst.msk [vmem:[#allocation2 + $0x30] sm:$0xff] %vm32_vm0, %v520_v9 }
   0xc   :  { %40 = vst.msk [vmem:[#allocation2 + $0x38] sm:$0xff] %vm32_vm0, %v520_v9  ;;  %v652_v18 = vld [vmem:[#allocation2 + $0x20] sm:$0xff] }
   0xd   :  { %50 = vst.msk [vmem:[#allocation4 + $0x8] sm:$0xff] %vm32_vm0, %v521_v17  ;;  %v656_v20 = vld [vmem:[#allocation2] sm:$0xff] }
   0xe   :  { %41 = vst.msk [vmem:[#allocation3] sm:$0xff] %vm32_vm0, %v521_v17  ;;  %v685_v32 = vld [vmem:[#allocation2 + $0x8] sm:$0xff] }
   0xf   :  { %42 = vst.msk [vmem:[#allocation3 + $0x8] sm:$0xff] %vm32_vm0, %v521_v17  ;;  %v654_v19 = vld [vmem:[#allocation2 + $0x10] sm:$0xff] }
  0x10   :  { %43 = vst.msk [vmem:[#allocation3 + $0x10] sm:$0xff] %vm32_vm0, %v521_v17  ;;  %v683_v31 = vld [vmem:[#allocation2 + $0x18] sm:$0xff] }
  0x11   :  { %44 = vst.msk [vmem:[#allocation3 + $0x18] sm:$0xff] %vm32_vm0, %v521_v17  ;;  %v681_v30 = vld [vmem:[#allocation2 + $0x28] sm:$0xff] }
  0x12   :  { %84 = vmax.xlane.f32.xlu1 %v577_v7  ;;  %45 = vst.msk [vmem:[#allocation3 + $0x20] sm:$0xff] %vm32_vm0, %v521_v17  ;;  %v713_v43 = vld [vmem:[#allocation2 + $0x30] sm:$0xff] }
  0x13   :  { %82 = vmax.xlane.f32.xlu0 %v582_v8  ;;  %46 = vst.msk [vmem:[#allocation3 + $0x28] sm:$0xff] %vm32_vm0, %v521_v17  ;;  %v711_v42 = vld [vmem:[#allocation2 + $0x38] sm:$0xff] }
  0x14   :  { %47 = vst.msk [vmem:[#allocation3 + $0x30] sm:$0xff] %vm32_vm0, %v521_v17 }
  0x15   :  { %48 = vst.msk [vmem:[#allocation3 + $0x38] sm:$0xff] %vm32_vm0, %v521_v17 }
  0x16   :  { %49 = vst.msk [vmem:[#allocation4] sm:$0xff] %vm32_vm0, %v521_v17 }
  0x17   :  { %51 = vst.msk [vmem:[#allocation4 + $0x10] sm:$0xff] %vm32_vm0, %v521_v17 }
  0x18   :  { %52 = vst.msk [vmem:[#allocation4 + $0x18] sm:$0xff] %vm32_vm0, %v521_v17 }
  0x19   :  { %53 = vst.msk [vmem:[#allocation4 + $0x20] sm:$0xff] %vm32_vm0, %v521_v17 }
  0x1a   :  { %54 = vst.msk [vmem:[#allocation4 + $0x28] sm:$0xff] %vm32_vm0, %v521_v17 }
  0x1b   :  { %55 = vst.msk [vmem:[#allocation4 + $0x30] sm:$0xff] %vm32_vm0, %v521_v17 }
  0x1c   :  { %56 = vst.msk [vmem:[#allocation4 + $0x38] sm:$0xff] %vm32_vm0, %v521_v17 }
  0x22   :  { %251 = vperm.xlu2 %443, %v596_v10  }
  0x27   :  { %248 = vperm.xlu0 %442, %v603_v11  }
  0x2a   :  { %260 = vperm.xlu2 %443, %v609_v12  }
  0x2b   :  { %254 = vperm.xlu1 %444, %v614_v13  }
  0x2f   :  { %257 = vperm.xlu0 %442, %v621_v14  }
  0x33   :  { %263 = vperm.xlu1 %444, %v627_v15  }
  0x37   :  { %266 = vperm.xlu0 %442, %v633_v16  }
  0x75   :  { %v79_v21 = vpop.xlane.xlu2 %78  ;;  %v75_v22 = vpop.xlane.xlu1 %74 }
  0x76   :  { %v659_v23 = vmax.f32 %v652_v18, %v79_v21  ;;  %v662_v24 = vmax.f32 %v654_v19, %v75_v22  ;;  %v71_v25 = vpop.xlane.xlu0 %70 }
  0x77   :  { %v665_v26 = vmax.f32 %v656_v20, %v71_v25 }
  0x78   :  { %v106_v27 = vsub.f32 %v652_v18, %v659_v23  ;;  %235 = vst.msk [vmem:[#allocation2 + $0x20] sm:$0xff] %vm32_vm0, %v659_v23  ;;  %v104_v28 = vsub.f32 %v654_v19, %v662_v24  ;;  %146 = vperm.xlu1 %444, %v662_v24   ;;  %v96_v19 = vld [vmem:[#allocation3 + $0x10] sm:$0xff] }
  0x79   :  { %233 = vst.msk [vmem:[#allocation2 + $0x10] sm:$0xff] %vm32_vm0, %v662_v24  ;;  %v102_v29 = vsub.f32 %v656_v20, %v665_v26  ;;  %136 = vperm.xlu2 %443, %v665_v26  }
  0x7a   :  { %231 = vst.msk [vmem:[#allocation2] sm:$0xff] %vm32_vm0, %v665_v26  ;;  %v114_v20 = vmul.f32 1.442695, %v104_v28  ;;  %v100_v28 = vld [vmem:[#allocation3 + $0x30] sm:$0xff] }
  0x7d   :  { %v81_v33 = vpop.xlane.xlu2 %80  ;;  %v77_v34 = vpop.xlane.xlu1 %76 }
  0x7e   :  { %v688_v35 = vmax.f32 %v681_v30, %v81_v33  ;;  %v691_v36 = vmax.f32 %v683_v31, %v77_v34  ;;  %v73_v37 = vpop.xlane.xlu0 %72 }
  0x7f   :  { %v694_v38 = vmax.f32 %v685_v32, %v73_v37 }
  0x80   :  { %v107_v39 = vsub.f32 %v681_v30, %v688_v35  ;;  %236 = vst.msk [vmem:[#allocation2 + $0x28] sm:$0xff] %vm32_vm0, %v688_v35  ;;  %v105_v40 = vsub.f32 %v683_v31, %v691_v36  ;;  %161 = vperm.xlu1 %444, %v688_v35   ;;  %v118_v31 = vmul.f32 1.442695, %v106_v27 }
  0x81   :  { %234 = vst.msk [vmem:[#allocation2 + $0x18] sm:$0xff] %vm32_vm0, %v691_v36  ;;  %v103_v41 = vsub.f32 %v685_v32, %v694_v38  ;;  %151 = vperm.xlu2 %443, %v691_v36   ;;  %141 = vperm.xlu0 %442, %v694_v38  }
  0x82   :  { %232 = vst.msk [vmem:[#allocation2 + $0x8] sm:$0xff] %vm32_vm0, %v694_v38  ;;  %v120_v27 = vmul.f32 1.442695, %v107_v39  ;;  %v98_v38 = vld [vmem:[#allocation3 + $0x20] sm:$0xff]  ;;  %v101_v39 = vld [vmem:[#allocation3 + $0x38] sm:$0xff] }
  0x83   :  { %v112_v36 = vmul.f32 1.442695, %v103_v41 }
  0x85   :  { %v85_v44 = vpop.xlane.xlu1 %84  ;;  %v252_v53 = vpop.permute.xlu2 %251 }
  0x86   :  { %v716_v45 = vmax.f32 %v711_v42, %v85_v44  ;;  %v83_v46 = vpop.xlane.xlu0 %82  ;;  %vm272_vm1 = vcmp.eq.s32.totalorder %v738_v52, %v252_v53 }
  0x87   :  { %v719_v47 = vmax.f32 %v713_v43, %v83_v46  ;;  %v280_v54 = vsel %vm272_vm1, %v569_v6, 0.0  ;;  %vm329_vm1 = vcmp.ne.s32.totalorder %v735_v50, 4294967196 }
  0x88   :  { %v109_v48 = vsub.f32 %v711_v42, %v716_v45  ;;  %238 = vst.msk [vmem:[#allocation2 + $0x38] sm:$0xff] %vm32_vm0, %v716_v45  ;;  %171 = vperm.xlu1 %444, %v716_v45  }
  0x89   :  { %156 = vperm.xlu2 %443, %v659_v23   ;;  %v108_v49 = vsub.f32 %v713_v43, %v719_v47  ;;  %237 = vst.msk [vmem:[#allocation2 + $0x30] sm:$0xff] %vm32_vm0, %v719_v47 }
  0x8a   :  { %v124_v18 = vmul.f32 1.442695, %v109_v48 }
  0x8d   :  { %v261_v57 = vpop.permute.xlu2 %260 }
  0x8e   :  { %vm275_vm4 = vcmp.eq.s32.totalorder %v738_v52, %v261_v57 }
  0x8f   :  { %v361_v12 = vld [vmem:[#allocation2 + $0x38] sm:$0xff] }
  0x91   :  { %166 = vperm.xlu2 %443, %v719_v47  }
  0x99   :  { %269 = vperm.xlu2 %443, %v735_v50   ;;  %v249_v55 = vpop.permute.xlu0 %248 }
  0x9a   :  { %vm271_vm2 = vcmp.eq.s32.totalorder %v738_v52, %v249_v55 }
  0x9b   :  { %v279_v56 = vsel %vm271_vm2, %v551_v2, 0.0 }
  0x9d   :  { %v255_v61 = vpop.permute.xlu1 %254 }
  0x9e   :  { %vm273_vm3 = vcmp.eq.s32.totalorder %v738_v52, %v255_v61 }
  0xa1   :  { %v258_v17 = vpop.permute.xlu0 %257 }
  0xa2   :  { %vm274_vm6 = vcmp.eq.s32.totalorder %v738_v52, %v258_v17  ;;  %v240_v17 = vld [vmem:[#allocation4 + $0x8] sm:$0xff] }
  0xa3   :  { %v282_v61 = vsel %vm274_vm6, %v564_v5, 0.0 }
  0xa5   :  { %v264_v21 = vpop.permute.xlu1 %263 }
  0xa6   :  { %vm276_vm5 = vcmp.eq.s32.totalorder %v738_v52, %v264_v21 }
  0xa9   :  { %v267_v34 = vpop.permute.xlu0 %266 }
  0xaa   :  { %vm277_vm8 = vcmp.eq.s32.totalorder %v738_v52, %v267_v34  ;;  %v94_v34 = vld [vmem:[#allocation3] sm:$0xff] }
  0xab   :  { %289 = vadd.xlane.f32.xlu0 %v280_v54  ;;  %v285_v57 = vsel %vm277_vm8, %v582_v8, 0.0 }
  0xc2   :  { %287 = vadd.xlane.f32.xlu2 %v279_v56 }
  0xd3   :  { %v137_v58 = vpop.permute.xlu2 %136 }
  0xd4   :  { %v174_v59 = vsub.f32 %v551_v2, %v137_v58 }
  0xd6   :  { %v182_v60 = vmul.f32 1.442695, %v174_v59 }
  0xd8   :  { %445 = vpow2.f32 %v182_v60 }
  0xdb   :  { %v152_v62 = vpop.permute.xlu2 %151 }
  0xdc   :  { %v177_v63 = vsub.f32 %v564_v5, %v152_v62 }
  0xde   :  { %v446_v3 = vpop.eup %445  ;;  %v188_v9 = vmul.f32 1.442695, %v177_v63 }
  0xdf   :  { %198 = vadd.xlane.f32.xlu1 %v446_v3 }
  0xe0   :  { %447 = vpow2.f32 %v188_v9 }
  0xe3   :  { %v157_v22 = vpop.permute.xlu2 %156 }
  0xe4   :  { %v178_v53 = vsub.f32 %v541_v0, %v157_v22 }
  0xe6   :  { %v448_v25 = vpop.eup %447  ;;  %v190_v55 = vmul.f32 1.442695, %v178_v53 }
  0xe7   :  { %204 = vadd.xlane.f32.xlu1 %v448_v25 }
  0xea   :  { %v147_v33 = vpop.permute.xlu1 %146 }
  0xeb   :  { %v176_v37 = vsub.f32 %v546_v1, %v147_v33  ;;  %v167_v2 = vpop.permute.xlu2 %166 }
  0xec   :  { %v180_v44 = vsub.f32 %v582_v8, %v167_v2  ;;  %v281_v2 = vsel %vm273_vm3, %v546_v1, 0.0 }
  0xed   :  { %v186_v46 = vmul.f32 1.442695, %v176_v37 }
  0xee   :  { %v194_v51 = vmul.f32 1.442695, %v180_v44 }
  0xef   :  { %449 = vpow2.f32 %v186_v46  ;;  %v283_v46 = vsel %vm275_vm4, %v541_v0, 0.0 }
  0xf0   :  { %451 = vpow2.f32 %v194_v51  ;;  %v284_v51 = vsel %vm276_vm5, %v559_v4, 0.0 }
  0xf1   :  { %453 = vpow2.f32 %v190_v55 }
  0xf2   :  { %v162_v54 = vpop.permute.xlu1 %161 }
  0xf3   :  { %v142_v56 = vpop.permute.xlu0 %141  ;;  %v179_v63 = vsub.f32 %v559_v4, %v162_v54  ;;  %v270_v53 = vpop.permute.xlu2 %269  ;;  %v239_v4 = vld [vmem:[#allocation4] sm:$0xff] }
  0xf4   :  { %v175_v58 = vsub.f32 %v569_v6, %v142_v56  ;;  %vm278_vm7 = vcmp.eq.s32.totalorder %v738_v52, %v270_v53  ;;  %v110_v52 = vmul.f32 1.442695, %v102_v29  ;;  %v122_v29 = vmul.f32 1.442695, %v108_v49 }
  0xf5   :  { %v450_v59 = vpop.eup %449  ;;  %v192_v22 = vmul.f32 1.442695, %v179_v63  ;;  %v286_v1 = vsel %vm278_vm7, %v577_v7, 0.0 }
  0xf6   :  { %v452_v60 = vpop.eup %451  ;;  %v184_v62 = vmul.f32 1.442695, %v175_v58  ;;  %202 = vadd.xlane.f32.xlu2 %v450_v59 }
  0xf7   :  { %210 = vadd.xlane.f32.xlu1 %v452_v60  ;;  %v454_v25 = vpop.eup %453  ;;  %v97_v60 = vld [vmem:[#allocation3 + $0x18] sm:$0xff] }
  0xf8   :  { %455 = vpow2.f32 %v184_v62 }
  0xfa   :  { %v172_v3 = vpop.permute.xlu1 %171 }
  0xfb   :  { %v181_v9 = vsub.f32 %v577_v7, %v172_v3  ;;  %v116_v7 = vmul.f32 1.442695, %v105_v40 }
  0xfd   :  { %v196_v33 = vmul.f32 1.442695, %v181_v9 }
  0xfe   :  { %v456_v37 = vpop.eup %455  ;;  %206 = vadd.xlane.f32.xlu2 %v454_v25 }
  0xff   :  { %457 = vpow2.f32 %v196_v33  ;;  %200 = vadd.xlane.f32.xlu0 %v456_v37 }
 0x100   :  { %459 = vpow2.f32 %v192_v22  ;;  %v95_v22 = vld [vmem:[#allocation3 + $0x8] sm:$0xff] }
 0x101   :  { %461 = vpow2.f32 %v110_v52 }
 0x102   :  { %463 = vpow2.f32 %v116_v7 }
 0x103   :  { %465 = vpow2.f32 %v114_v20 }
 0x104   :  { %467 = vpow2.f32 %v122_v29 }
 0x105   :  { %v458_v6 = vpop.eup %457  ;;  %469 = vpow2.f32 %v118_v31 }
 0x106   :  { %v460_v44 = vpop.eup %459  ;;  %212 = vadd.xlane.f32.xlu1 %v458_v6  ;;  %291 = vadd.xlane.f32.xlu2 %v281_v2  ;;  %471 = vpow2.f32 %v112_v36 }
 0x107   :  { %208 = vadd.xlane.f32.xlu0 %v460_v44  ;;  %v462_v8 = vpop.eup %461  ;;  %473 = vpow2.f32 %v124_v18  ;;  %v99_v44 = vld [vmem:[#allocation3 + $0x28] sm:$0xff] }
 0x108   :  { %v126_v55 = vmul.f32 %v462_v8, %v94_v34  ;;  %v464_v59 = vpop.eup %463  ;;  %475 = vpow2.f32 %v120_v27  ;;  %v243_v34 = vld [vmem:[#allocation4 + $0x20] sm:$0xff]  ;;  %v355_v27 = vld [vmem:[#allocation2 + $0x8] sm:$0xff] }
 0x109   :  { %v129_v62 = vmul.f32 %v464_v59, %v97_v60  ;;  %v466_v40 = vpop.eup %465 }
 0x10a   :  { %v468_v24 = vpop.eup %467  ;;  %v128_v43 = vmul.f32 %v466_v40, %v96_v19 }
 0x10b   :  { %v132_v47 = vmul.f32 %v468_v24, %v100_v28  ;;  %v470_v32 = vpop.eup %469  ;;  %v356_v28 = vld [vmem:[#allocation2 + $0x10] sm:$0xff] }
 0x10c   :  { %v472_v41 = vpop.eup %471  ;;  %v130_v25 = vmul.f32 %v470_v32, %v98_v38 }
 0x10d   :  { %v127_v42 = vmul.f32 %v472_v41, %v95_v22  ;;  %v474_v35 = vpop.eup %473  ;;  %v246_v22 = vld [vmem:[#allocation4 + $0x38] sm:$0xff] }
 0x10e   :  { %295 = vadd.xlane.f32.xlu1 %v283_v46  ;;  %297 = vadd.xlane.f32.xlu2 %v284_v51  ;;  %v476_v2 = vpop.eup %475  ;;  %v241_v46 = vld [vmem:[#allocation4 + $0x10] sm:$0xff]  ;;  %v133_v51 = vmul.f32 %v474_v35, %v101_v39 }
 0x10f   :  { %293 = vadd.xlane.f32.xlu0 %v282_v61 }
 0x116   :  { %301 = vadd.xlane.f32.xlu1 %v286_v1 }
 0x117   :  { %299 = vadd.xlane.f32.xlu0 %v285_v57  ;;  %v131_v57 = vmul.f32 %v476_v2, %v99_v44 }
 0x11e   :  { %v290_v0 = vpop.xlane.xlu0 %289 }
 0x11f   :  { %v304_v21 = vadd.f32 %v290_v0, %v240_v17 }
 0x121   :  { %312 = vst.msk [vmem:[#allocation4 + $0x8] sm:$0xff] %vm32_vm0, %v304_v21 }
 0x135   :  { %v288_v54 = vpop.xlane.xlu2 %287 }
 0x136   :  { %v303_v5 = vadd.f32 %v288_v54, %v239_v4 }
 0x138   :  { %311 = vst.msk [vmem:[#allocation4] sm:$0xff] %vm32_vm0, %v303_v5 }
 0x152   :  { %v199_v56 = vpop.xlane.xlu1 %198 }
 0x153   :  { %v214_v58 = vadd.f32 %v199_v56, %v126_v55  ;;  %v244_v55 = vld [vmem:[#allocation4 + $0x28] sm:$0xff]  ;;  %v354_v56 = vld [vmem:[#allocation2] sm:$0xff] }
 0x155   :  { %223 = vst.msk [vmem:[#allocation3] sm:$0xff] %vm32_vm0, %v214_v58  ;;  %v242_v58 = vld [vmem:[#allocation4 + $0x18] sm:$0xff] }
 0x15a   :  { %v205_v63 = vpop.xlane.xlu1 %204 }
 0x15b   :  { %v217_v26 = vadd.f32 %v205_v63, %v129_v62 }
 0x15c   :  { %v330_v33 = vld [vmem:[#allocation3] sm:$0xff] }
 0x15d   :  { %226 = vst.msk [vmem:[#allocation3 + $0x18] sm:$0xff] %vm32_vm0, %v217_v26  ;;  %477 = vlog2.f32 %v330_v33  ;;  %v245_v33 = vld [vmem:[#allocation4 + $0x30] sm:$0xff] }
 0x163   :  { %v478_v61 = vpop.eup %477 }
 0x164   :  { %v333_v52 = vld [vmem:[#allocation3 + $0x18] sm:$0xff]  ;;  %v339_v7 = vmul.f32 0.6931472, %v478_v61 }
 0x165   :  { %v357_v61 = vld [vmem:[#allocation2 + $0x18] sm:$0xff] }
 0x166   :  { %v362_v60 = vadd.f32 %v354_v56, %v339_v7 }
 0x169   :  { %v203_v49 = vpop.xlane.xlu2 %202 }
 0x16a   :  { %v211_v3 = vpop.xlane.xlu1 %210  ;;  %v216_v9 = vadd.f32 %v203_v49, %v128_v43  ;;  %v370_v43 = vld [vmem:[#allocation4] sm:$0xff] }
 0x16b   :  { %v220_v23 = vadd.f32 %v211_v3, %v132_v47 }
 0x16c   :  { %225 = vst.msk [vmem:[#allocation3 + $0x10] sm:$0xff] %vm32_vm0, %v216_v9  ;;  %v378_v9 = vsub.f32 %v362_v60, %v370_v43 }
 0x16d   :  { %229 = vst.msk [vmem:[#allocation3 + $0x30] sm:$0xff] %vm32_vm0, %v220_v23 }
 0x171   :  { %v207_v37 = vpop.xlane.xlu2 %206 }
 0x172   :  { %v218_v45 = vadd.f32 %v207_v37, %v130_v25  ;;  %v201_v48 = vpop.xlane.xlu0 %200  ;;  %v371_v25 = vld [vmem:[#allocation4 + $0x8] sm:$0xff] }
 0x173   :  { %v215_v6 = vadd.f32 %v201_v48, %v127_v42  ;;  %v332_v30 = vld [vmem:[#allocation3 + $0x10] sm:$0xff] }
 0x174   :  { %227 = vst.msk [vmem:[#allocation3 + $0x20] sm:$0xff] %vm32_vm0, %v218_v45  ;;  %479 = vlog2.f32 %v332_v30  ;;  %v336_v20 = vld [vmem:[#allocation3 + $0x30] sm:$0xff]  ;;  %v386_v45 = vsel %vm322_vm9, %v378_v9, 0.0 }
 0x175   :  { %224 = vst.msk [vmem:[#allocation3 + $0x8] sm:$0xff] %vm32_vm0, %v215_v6  ;;  %v358_v6 = vld [vmem:[#allocation2 + $0x20] sm:$0xff] }
 0x179   :  { %v213_v53 = vpop.xlane.xlu1 %212  ;;  %v292_v1 = vpop.xlane.xlu2 %291 }
 0x17a   :  { %v221_v17 = vadd.f32 %v213_v53, %v133_v51  ;;  %v305_v0 = vadd.f32 %v292_v1, %v241_v46  ;;  %v209_v21 = vpop.xlane.xlu0 %208  ;;  %v480_v8 = vpop.eup %479  ;;  %v394_v53 = vsel %vm32_vm0, %v386_v45, 0.0 }
 0x17b   :  { %v219_v4 = vadd.f32 %v209_v21, %v131_v57  ;;  %v334_v54 = vld [vmem:[#allocation3 + $0x20] sm:$0xff]  ;;  %v343_v59 = vmul.f32 0.6931472, %v480_v8 }
 0x17c   :  { %230 = vst.msk [vmem:[#allocation3 + $0x38] sm:$0xff] %vm32_vm0, %v221_v17  ;;  %v331_v5 = vld [vmem:[#allocation3 + $0x8] sm:$0xff]  ;;  %481 = vlog2.f32 %v334_v54 }
 0x17d   :  { %313 = vst.msk [vmem:[#allocation4 + $0x10] sm:$0xff] %vm32_vm0, %v305_v0  ;;  %483 = vlog2.f32 %v331_v5  ;;  %v364_v49 = vadd.f32 %v356_v28, %v343_v59 }
 0x17e   :  { %228 = vst.msk [vmem:[#allocation3 + $0x28] sm:$0xff] %vm32_vm0, %v219_v4  ;;  %485 = vlog2.f32 %v333_v52  ;;  %v359_v52 = vld [vmem:[#allocation2 + $0x28] sm:$0xff] }
 0x17f   :  { %487 = vlog2.f32 %v336_v20 }
 0x181   :  { %v296_v62 = vpop.xlane.xlu1 %295  ;;  %v298_v63 = vpop.xlane.xlu2 %297 }
 0x182   :  { %v482_v26 = vpop.eup %481  ;;  %v307_v29 = vadd.f32 %v296_v62, %v243_v34  ;;  %v308_v31 = vadd.f32 %v298_v63, %v244_v55  ;;  %v294_v36 = vpop.xlane.xlu0 %293  ;;  %v360_v63 = vld [vmem:[#allocation2 + $0x30] sm:$0xff] }
 0x183   :  { %v484_v40 = vpop.eup %483  ;;  %v306_v19 = vadd.f32 %v294_v36, %v242_v58  ;;  %v337_v24 = vld [vmem:[#allocation3 + $0x38] sm:$0xff]  ;;  %v347_v32 = vmul.f32 0.6931472, %v482_v26 }
 0x184   :  { %315 = vst.msk [vmem:[#allocation4 + $0x20] sm:$0xff] %vm32_vm0, %v307_v29  ;;  %v341_v47 = vmul.f32 0.6931472, %v484_v40  ;;  %v372_v3 = vld [vmem:[#allocation4 + $0x10] sm:$0xff]  ;;  %v486_v18 = vpop.eup %485  ;;  %489 = vlog2.f32 %v337_v24 }
 0x185   :  { %316 = vst.msk [vmem:[#allocation4 + $0x28] sm:$0xff] %vm32_vm0, %v308_v31  ;;  %v335_v23 = vld [vmem:[#allocation3 + $0x28] sm:$0xff]  ;;  %v380_v41 = vsub.f32 %v364_v49, %v372_v3  ;;  %v345_v37 = vmul.f32 0.6931472, %v486_v18  ;;  %v488_v30 = vpop.eup %487  ;;  %v366_v2 = vadd.f32 %v358_v6, %v347_v32 }
 0x186   :  { %314 = vst.msk [vmem:[#allocation4 + $0x18] sm:$0xff] %vm32_vm0, %v306_v19  ;;  %491 = vlog2.f32 %v335_v23  ;;  %v363_v38 = vadd.f32 %v355_v27, %v341_v47  ;;  %v351_v34 = vmul.f32 0.6931472, %v488_v30 }
 0x187   :  { %v388_v46 = vsel %vm324_vm10, %v380_v41, 0.0  ;;  %v365_v11 = vadd.f32 %v357_v61, %v345_v37 }
 0x188   :  { %v379_v42 = vsub.f32 %v363_v38, %v371_v25  ;;  %v397_v54 = vsel %vm32_vm0, %v388_v46, 0.0  ;;  %v368_v29 = vadd.f32 %v360_v63, %v351_v34 }
 0x189   :  { %v302_v48 = vpop.xlane.xlu1 %301 }
 0x18a   :  { %v310_v35 = vadd.f32 %v302_v48, %v246_v22  ;;  %v300_v39 = vpop.xlane.xlu0 %299  ;;  %v387_v44 = vsel %vm323_vm11, %v379_v42, 0.0  ;;  %v490_v51 = vpop.eup %489 }
 0x18b   :  { %v309_v13 = vadd.f32 %v300_v39, %v245_v33  ;;  %v374_v10 = vld [vmem:[#allocation4 + $0x20] sm:$0xff]  ;;  %v395_v1 = vsel %vm32_vm0, %v387_v44, 0.0  ;;  %v353_v5 = vmul.f32 0.6931472, %v490_v51 }
 0x18c   :  { %v492_v57 = vpop.eup %491  ;;  %318 = vst.msk [vmem:[#allocation4 + $0x38] sm:$0xff] %vm32_vm0, %v310_v35  ;;  %v382_v17 = vsub.f32 %v366_v2, %v374_v10  ;;  %v396_v0 = vadd.f32 %v395_v1, %v394_v53  ;;  %v375_v56 = vld [vmem:[#allocation4 + $0x28] sm:$0xff] }
 0x18d   :  { %317 = vst.msk [vmem:[#allocation4 + $0x30] sm:$0xff] %vm32_vm0, %v309_v13  ;;  %v349_v21 = vmul.f32 0.6931472, %v492_v57  ;;  %v373_v4 = vld [vmem:[#allocation4 + $0x18] sm:$0xff]  ;;  %v369_v20 = vadd.f32 %v361_v12, %v353_v5 }
 0x18e   :  { %v381_v7 = vsub.f32 %v365_v11, %v373_v4  ;;  %v398_v8 = vadd.f32 %v397_v54, %v396_v0  ;;  %v390_v59 = vsel %vm326_vm13, %v382_v17, 0.0 }
 0x18f   :  { %v367_v55 = vadd.f32 %v359_v52, %v349_v21  ;;  %v401_v40 = vsel %vm32_vm0, %v390_v59, 0.0 }
 0x190   :  { %v389_v58 = vsel %vm325_vm12, %v381_v7, 0.0 }
 0x191   :  { %v383_v60 = vsub.f32 %v367_v55, %v375_v56  ;;  %v399_v62 = vsel %vm32_vm0, %v389_v58, 0.0 }
 0x192   :  { %v400_v26 = vadd.f32 %v399_v62, %v398_v8 }
 0x193   :  { %v377_v31 = vld [vmem:[#allocation4 + $0x38] sm:$0xff]  ;;  %v391_v36 = vsel %vm327_vm14, %v383_v60, 0.0 }
 0x194   :  { %v376_v15 = vld [vmem:[#allocation4 + $0x30] sm:$0xff]  ;;  %v385_v14 = vsub.f32 %v369_v20, %v377_v31  ;;  %v402_v19 = vadd.f32 %v401_v40, %v400_v26  ;;  %v403_v24 = vsel %vm32_vm0, %v391_v36, 0.0 }
 0x195   :  { %v384_v28 = vsub.f32 %v368_v29, %v376_v15 }
 0x196   :  { %v404_v43 = vadd.f32 %v403_v24, %v402_v19  ;;  %v393_v49 = vsel %vm329_vm1, %v385_v14, 0.0 }
 0x197   :  { %v392_v47 = vsel %vm328_vm15, %v384_v28, 0.0  ;;  %v407_v16 = vsel %vm32_vm0, %v393_v49, 0.0 }
 0x198   :  { %v405_v3 = vsel %vm32_vm0, %v392_v47, 0.0 }
 0x199   :  { %v406_v9 = vadd.f32 %v405_v3, %v404_v43 }
 0x19b   :  { %v408_v18 = vadd.f32 %v407_v16, %v406_v9 }
 0x19d   :  { %409 = vadd.xlane.f32.xlu2 %v408_v18 }
 0x210   :  { %v410_v23 = vpop.xlane.xlu2 %409 }
 0x211   :  { %v411_v27 = vrot.slane %v410_v23, 4 }
 0x213   :  { %v412_v32 = vadd.f32 %v411_v27, %v410_v23 }
 0x215   :  { %v413_v50 = vrot.slane %v412_v32, 2 }
 0x217   :  { %v414_v38 = vadd.f32 %v413_v50, %v412_v32 }
 0x219   :  { %v415_v41 = vrot.slane %v414_v38, 1 }
 0x21b   :  { %v416_v22 = vadd.f32 %v415_v41, %v414_v38 }
 0x21d   :  { %436 = vpush %v416_v22 }
 0x24e   :  { %s437_s16 = spop %436 }
 0x24f   :  { %v418_v25 = vstv %s437_s16 }
 0x250   :  { %419 = vst [vmem:[#allocation5] sm:$0xff] %v418_v25 }
 0x251   :  { %430 = dma.vmem_to_hbm [thread:$0]  %s426_s12, 128, %s428_s15, [#allocation6]  }
 0x252   :  { %517 = dma.done.wait [#allocation6], 128  }
 0x253   :  { %518 = vsyncadd [#allocation6], 4294967168 }
 0x254   :  { %435 = vsyncpa [#allocation6], 1 }

</bundles_post_ra>
